<compile_context>
chip_gen: v7x
topology: tpu7x:2x2x1
jax: 0.10.0
libtpu: 0.0.40
codegen_flags: <defaults>
</compile_context>

<pallas_src>
import math

import jax
import jax.numpy as jnp
from jax.experimental import pallas as pl
from jax.experimental.pallas import tpu as pltpu  # noqa: F401  (TPU backend import)


def fuse_head_kernel(x_ref, w1_ref, w2_ref, w3_ref, shift_ref, o_ref):
    C = o_ref.shape[1]

    # Linear1 (BN1 scale pre-folded into w1) -> folded shift -> ReLU
    h = jnp.dot(x_ref[...], w1_ref[...], preferred_element_type=jnp.float32)
    h = jnp.maximum(h + shift_ref[0:1, :], 0.0)

    # Linear2 (BN2 scale pre-folded into w2) -> folded shift -> ReLU
    h = jnp.dot(h, w2_ref[...], preferred_element_type=jnp.float32)
    h = jnp.maximum(h + shift_ref[1:2, :], 0.0)

    # Linear3 classifier head (bias stored zero-padded in shift row 2)
    h = jnp.dot(h, w3_ref[...], preferred_element_type=jnp.float32)
    o_ref[...] = (h + shift_ref[2:3, :C]).astype(o_ref.dtype)


def fuse_head(fx, fz, ft, w1f, w2f, w3, shifts):
    """fx/fz/ft: [B,E]; w1f: [3E,E]; w2f: [E,E]; w3: [E,C]; shifts: [3,E]."""
    # Lane-contiguous concat done in the wrapper (single input DMA into the kernel).
    x = jnp.concatenate([fx, fz, ft], axis=1)

    B, K = x.shape
    E = w2f.shape[0]
    C = w3.shape[1]

    flops = 2 * B * (K * E + E * E + E * C)
    bytes_accessed = 4 * (x.size + w1f.size + w2f.size + w3.size + shifts.size + B * C)

    def full(a):
        nd = a.ndim
        return pl.BlockSpec(a.shape, lambda *_: (0,) * nd)

    args = (x, w1f, w2f, w3, shifts)
    return pl.pallas_call(
        fuse_head_kernel,
        out_shape=jax.ShapeDtypeStruct((B, C), jnp.float32),
        grid=(),  # total resident data ~80 KiB: any tiling grid is pure overhead
        in_specs=[full(a) for a in args],
        out_specs=pl.BlockSpec((B, C), lambda *_: (0, 0)),
        cost_estimate=pl.CostEstimate(
            flops=flops, transcendentals=0, bytes_accessed=bytes_accessed),
    )(*args)


def fold_bn_into_linear(w, b, gamma, beta, mean, var, eps=1e-5):
    """Fold eval-mode BatchNorm1d into the preceding Linear: y = x @ w' + shift."""
    scale = gamma / jnp.sqrt(var + eps)       # [E]
    w_folded = w * scale[None, :]              # scale each output column
    shift = (b - mean) * scale + beta          # [E]
    return w_folded, shift


def reference(fx, fz, ft,
              w1, b1, g1, bt1, m1, v1,
              w2, b2, g2, bt2, m2, v2,
              w3, b3, eps=1e-5):
    """Pure-JAX FuseHead forward (eval-mode BatchNorm with running stats)."""
    x = jnp.concatenate([fx, fz, ft], axis=1)
    h = x @ w1 + b1
    h = (h - m1) / jnp.sqrt(v1 + eps) * g1 + bt1
    h = jnp.maximum(h, 0.0)
    h = h @ w2 + b2
    h = (h - m2) / jnp.sqrt(v2 + eps) * g2 + bt2
    h = jnp.maximum(h, 0.0)
    return h @ w3 + b3


if __name__ == "__main__":
    B = 8
    embed_dim = 64
    num_classes = 10
    E = embed_dim
    eps = 1e-5

    key = jax.random.PRNGKey(0)
    keys = jax.random.split(key, 20)

    # Inputs: image / label-embedding / time features, [B, E] each.
    fx = jax.random.normal(keys[0], (B, E), dtype=jnp.float32)
    fz = jax.random.normal(keys[1], (B, E), dtype=jnp.float32)
    ft = jax.random.normal(keys[2], (B, E), dtype=jnp.float32)

    def uinit(k, shape, fan_in):
        bound = 1.0 / math.sqrt(fan_in)
        return jax.random.uniform(k, shape, dtype=jnp.float32,
                                  minval=-bound, maxval=bound)

    # Linear weights stored [in, out] (transposed vs torch's [out, in]).
    w1 = uinit(keys[3], (3 * E, E), 3 * E)
    b1 = uinit(keys[4], (E,), 3 * E)
    w2 = uinit(keys[5], (E, E), E)
    b2 = uinit(keys[6], (E,), E)
    w3 = uinit(keys[7], (E, num_classes), E)
    b3 = uinit(keys[8], (num_classes,), E)

    # BatchNorm1d parameters + running stats (inference mode), non-trivial values.
    g1 = jax.random.uniform(keys[9], (E,), dtype=jnp.float32, minval=0.5, maxval=1.5)
    bt1 = 0.1 * jax.random.normal(keys[10], (E,), dtype=jnp.float32)
    m1 = 0.1 * jax.random.normal(keys[11], (E,), dtype=jnp.float32)
    v1 = jax.random.uniform(keys[12], (E,), dtype=jnp.float32, minval=0.5, maxval=1.5)
    g2 = jax.random.uniform(keys[13], (E,), dtype=jnp.float32, minval=0.5, maxval=1.5)
    bt2 = 0.1 * jax.random.normal(keys[14], (E,), dtype=jnp.float32)
    m2 = 0.1 * jax.random.normal(keys[15], (E,), dtype=jnp.float32)
    v2 = jax.random.uniform(keys[16], (E,), dtype=jnp.float32, minval=0.5, maxval=1.5)

    # Host-side, one-time parameter preparation (eval-mode BN folded into weights).
    w1f, t1 = fold_bn_into_linear(w1, b1, g1, bt1, m1, v1, eps)
    w2f, t2 = fold_bn_into_linear(w2, b2, g2, bt2, m2, v2, eps)
    # Pack the three small per-feature vectors into one [3, E] input:
    #   row 0 = layer-1 folded shift, row 1 = layer-2 folded shift,
    #   row 2 = classifier bias zero-padded from C to E lanes.
    b3_pad = jnp.zeros((E,), jnp.float32).at[:num_classes].set(b3)
    shifts = jnp.stack([t1, t2, b3_pad], axis=0)

    out = fuse_head(fx, fz, ft, w1f, w2f, w3, shifts)
    out = jax.block_until_ready(out)

    ref = reference(fx, fz, ft,
                    w1, b1, g1, bt1, m1, v1,
                    w2, b2, g2, bt2, m2, v2,
                    w3, b3, eps)

    assert out.shape == (B, num_classes)
    max_diff = float(jnp.max(jnp.abs(out - ref)))
    # Folding the BN scale into the weights reorders f32 rounding vs the reference;
    # 1e-4 comfortably covers that while remaining far tighter than bf16 error.
    assert jnp.allclose(out, ref, atol=1e-4, rtol=1e-4), f"max diff {max_diff}"

    print("KERNEL_OK")
</pallas_src>

<mosaic_0001>
module attributes {stable_mosaic.version = 11 : i64} {
  func.func @fuse_head_kernel(%arg0: memref<8x192xf32, #tpu.memory_space<vmem>>, %arg1: memref<192x64xf32, #tpu.memory_space<vmem>>, %arg2: memref<64x64xf32, #tpu.memory_space<vmem>>, %arg3: memref<64x10xf32, #tpu.memory_space<vmem>>, %arg4: memref<3x64xf32, #tpu.memory_space<vmem>>, %arg5: memref<8x10xf32, #tpu.memory_space<vmem>>) attributes {dimension_semantics = [], scalar_prefetch = 0 : i64, scratch_operands = 0 : i64, tpu.core_type = #tpu.core_type<tc>} {
    %c0 = arith.constant 0 : index
    %c0_0 = arith.constant 0 : index
    %0 = vector.load %arg0[%c0, %c0_0] : memref<8x192xf32, #tpu.memory_space<vmem>>, vector<8x192xf32>
    %c0_1 = arith.constant 0 : index
    %c0_2 = arith.constant 0 : index
    %1 = vector.load %arg1[%c0_1, %c0_2] : memref<192x64xf32, #tpu.memory_space<vmem>>, vector<192x64xf32>
    %cst = arith.constant dense<0.000000e+00> : vector<8x64xf32>
    %2 = tpu.matmul %0, %1, %cst {dimension_numbers = #tpu.dot_dimension_numbers<[1], [0], [0], [1], [0, 0, 1, 1], [], []>} : vector<8x192xf32>, vector<192x64xf32>, vector<8x64xf32> -> vector<8x64xf32>
    %c0_3 = arith.constant 0 : index
    %c0_4 = arith.constant 0 : index
    %3 = vector.load %arg4[%c0_3, %c0_4] : memref<3x64xf32, #tpu.memory_space<vmem>>, vector<1x64xf32>
    %4 = vector.broadcast %3 : vector<1x64xf32> to vector<8x64xf32>
    %5 = arith.addf %2, %4 : vector<8x64xf32>
    %cst_5 = arith.constant 0.000000e+00 : f32
    %6 = vector.broadcast %cst_5 : f32 to vector<8x64xf32>
    %7 = arith.maximumf %5, %6 : vector<8x64xf32>
    %c0_6 = arith.constant 0 : index
    %c0_7 = arith.constant 0 : index
    %8 = vector.load %arg2[%c0_6, %c0_7] : memref<64x64xf32, #tpu.memory_space<vmem>>, vector<64x64xf32>
    %cst_8 = arith.constant dense<0.000000e+00> : vector<8x64xf32>
    %9 = tpu.matmul %7, %8, %cst_8 {dimension_numbers = #tpu.dot_dimension_numbers<[1], [0], [0], [1], [0, 0, 1, 1], [], []>} : vector<8x64xf32>, vector<64x64xf32>, vector<8x64xf32> -> vector<8x64xf32>
    %c1 = arith.constant 1 : index
    %c0_9 = arith.constant 0 : index
    %10 = vector.load %arg4[%c1, %c0_9] : memref<3x64xf32, #tpu.memory_space<vmem>>, vector<1x64xf32>
    %11 = vector.broadcast %10 : vector<1x64xf32> to vector<8x64xf32>
    %12 = arith.addf %9, %11 : vector<8x64xf32>
    %cst_10 = arith.constant 0.000000e+00 : f32
    %13 = vector.broadcast %cst_10 : f32 to vector<8x64xf32>
    %14 = arith.maximumf %12, %13 : vector<8x64xf32>
    %c0_11 = arith.constant 0 : index
    %c0_12 = arith.constant 0 : index
    %15 = vector.load %arg3[%c0_11, %c0_12] : memref<64x10xf32, #tpu.memory_space<vmem>>, vector<64x10xf32>
    %cst_13 = arith.constant dense<0.000000e+00> : vector<8x10xf32>
    %16 = tpu.matmul %14, %15, %cst_13 {dimension_numbers = #tpu.dot_dimension_numbers<[1], [0], [0], [1], [0, 0, 1, 1], [], []>} : vector<8x64xf32>, vector<64x10xf32>, vector<8x10xf32> -> vector<8x10xf32>
    %c2 = arith.constant 2 : index
    %c0_14 = arith.constant 0 : index
    %17 = vector.load %arg4[%c2, %c0_14] : memref<3x64xf32, #tpu.memory_space<vmem>>, vector<1x10xf32>
    %18 = vector.broadcast %17 : vector<1x10xf32> to vector<8x10xf32>
    %19 = arith.addf %16, %18 : vector<8x10xf32>
    %c0_15 = arith.constant 0 : index
    %c0_16 = arith.constant 0 : index
    %20 = vector.load %arg5[%c0_15, %c0_16] : memref<8x10xf32, #tpu.memory_space<vmem>>, vector<8x10xf32>
    tpu.vector_store %arg5[%c0_15, %c0_16], %19 {strides = array<i32>} : memref<8x10xf32, #tpu.memory_space<vmem>>, vector<8x10xf32>,
    return
  }
}

</mosaic_0001>

<bundles_post_ra>
// kernel: tpu_custom_call.1
= control target key start
LH: loop header
LB: loop body
LE: loop exit
PB: predicated region body
PF: predicated region fallthrough
CT: control target
= control target key end

     0   :  { %v466_v3 = vmov 0.0|0.0   ;;  %vm52_vm0 = vcmask 523264   ;;  %s672_s0 = inlined_call_operand.vmem [shape: f32[8,192], index: 0, kind: input, shape index: {}]   ;;  %s673_s1 = inlined_call_operand.vmem [shape: f32[192,64], index: 1, kind: input, shape index: {}]   ;;  %s674_s2 = inlined_call_operand.vmem [shape: f32[64,64], index: 2, kind: input, shape index: {}]   ;;  %s675_s3 = inlined_call_operand.vmem [shape: f32[64,10], index: 3, kind: input, shape index: {}]   ;;  %s676_s4 = inlined_call_operand.vmem [shape: f32[3,64], index: 4, kind: input, shape index: {}]   ;;  %s677_s5 = inlined_call_operand.hbm [shape: f32[8,10], index: 5, kind: output, shape index: {}]  }
   0x1   :  { %v23_v0 = vld [vmem:[%s673_s1] sm:$0xff]  ;;  %v24_v1 = vld [vmem:[%s673_s1 + $0x8] sm:$0xff]  ;;  %v25_v2 = vld [vmem:[%s673_s1 + $0x10] sm:$0xff]  ;;  %378 = vmatprep.subr.bf16.mxu0 %v466_v3  ;;  %414 = vmatprep.subr.bf16.mxu1 %v466_v3 }
   0x2   :  { %v379_v4 = vpack.c.bf16 %v24_v1, %v23_v0  ;;  %v26_v5 = vld [vmem:[%s673_s1 + $0x18] sm:$0xff]  ;;  %v27_v7 = vld [vmem:[%s673_s1 + $0x20] sm:$0xff]  ;;  %v28_v8 = vld [vmem:[%s673_s1 + $0x28] sm:$0xff] }
   0x3   :  { %v382_v6 = vpack.c.bf16 %v26_v5, %v25_v2  ;;  %v385_v9 = vpack.c.bf16 %v28_v8, %v27_v7  ;;  %v29_v10 = vld [vmem:[%s673_s1 + $0x30] sm:$0xff]  ;;  %v30_v11 = vld [vmem:[%s673_s1 + $0x38] sm:$0xff]  ;;  %v22_v12 = vld [vmem:[%s672_s0 + $0x8] sm:$0xff] }
   0x4   :  { %380 = vmatpush1.bf16.msra.mxu0 %v379_v4  ;;  %v127_v13 = vld [vmem:[%s674_s2] sm:$0xff]  ;;  %317 = vmatprep.mubr.msk.f32.mxu0 %vm52_vm0, %v22_v12  ;;  %v128_v14 = vld [vmem:[%s674_s2 + $0x8] sm:$0xff]  ;;  %v129_v15 = vld [vmem:[%s674_s2 + $0x10] sm:$0xff]  ;;  %v388_v18 = vpack.c.bf16 %v30_v11, %v29_v10 }
   0x5   :  { %381 = vmatprep.subr.bf16.mxu0 %v466_v3  ;;  %v130_v16 = vld [vmem:[%s674_s2 + $0x18] sm:$0xff]  ;;  %v415_v17 = vpack.c.bf16 %v128_v14, %v127_v13 }
   0x8   :  { %383 = vmatpush1.bf16.msra.mxu0 %v382_v6 }
   0x9   :  { %384 = vmatprep.subr.bf16.mxu0 %v466_v3 }
   0xc   :  { %386 = vmatpush1.bf16.msra.mxu0 %v385_v9 }
   0xd   :  { %10 = vsyncpa [#allocation3], 0  ;;  %387 = vmatprep.subr.bf16.mxu0 %v466_v3  ;;  %v31_v19 = vld [vmem:[%s673_s1 + $0x40] sm:$0xff]  ;;  %v32_v20 = vld [vmem:[%s673_s1 + $0x48] sm:$0xff]  ;;  %416 = vmatpush3.bf16.msra.mxu1 %v415_v17  ;;  %v418_v21 = vpack.c.bf16 %v130_v16, %v129_v15  ;;  %vm467_vm1 = vmmov 0   ;;  %v468_v51 = vmov 0.0  }
   0xe   :  { %417 = vmatprep.subr.bf16.mxu1 %v466_v3  ;;  %v131_v22 = vld [vmem:[%s674_s2 + $0x20] sm:$0xff]  ;;  %v132_v23 = vld [vmem:[%s674_s2 + $0x28] sm:$0xff]  ;;  %v391_v24 = vpack.c.bf16 %v32_v20, %v31_v19  ;;  %v33_v25 = vld [vmem:[%s673_s1 + $0x50] sm:$0xff]  ;;  %356 = vmatprep.mubr.msk.f32.mxu1 %vm467_vm1, %v468_v51  ;;  %s469_s30 = smov [#allocation2]   ;;  %vm300_vm2 = vcmask 80896  }
   0xf   :  { %v34_v26 = vld [vmem:[%s673_s1 + $0x58] sm:$0xff]  ;;  %v421_v27 = vpack.c.bf16 %v132_v23, %v131_v22  ;;  %v35_v29 = vld [vmem:[%s673_s1 + $0x60] sm:$0xff]  ;;  %v36_v30 = vld [vmem:[%s673_s1 + $0x68] sm:$0xff]  ;;  %s308_s6 = sshll.u32 %s469_s30, 4  ;;  %s309_s6 = int_to_ptr.vmem [resolvable:$true] %s308_s6 }
  0x10   :  { %389 = vmatpush1.bf16.msra.mxu0 %v388_v18  ;;  %v394_v28 = vpack.c.bf16 %v34_v26, %v33_v25  ;;  %v397_v31 = vpack.c.bf16 %v36_v30, %v35_v29  ;;  %v37_v32 = vld [vmem:[%s673_s1 + $0x70] sm:$0xff]  ;;  %v38_v33 = vld [vmem:[%s673_s1 + $0x78] sm:$0xff]  ;;  %v39_v35 = vld [vmem:[%s673_s1 + $0x80] sm:$0xff]  ;;  %p447_p1 = scmp.lt.s32.totalorder %s309_s6, %s309_s6 }
  0x11   :  { %390 = vmatprep.subr.bf16.mxu0 %v466_v3  ;;  %419 = vmatpush3.bf16.msra.mxu1 %v418_v21  ;;  %v400_v34 = vpack.c.bf16 %v38_v33, %v37_v32  ;;  %v40_v36 = vld [vmem:[%s673_s1 + $0x88] sm:$0xff]  ;;  %v41_v38 = vld [vmem:[%s673_s1 + $0x90] sm:$0xff]  ;;  %v42_v39 = vld [vmem:[%s673_s1 + $0x98] sm:$0xff] }
  0x12   :  { %420 = vmatprep.subr.bf16.mxu1 %v466_v3  ;;  %v403_v37 = vpack.c.bf16 %v40_v36, %v39_v35  ;;  %v406_v40 = vpack.c.bf16 %v42_v39, %v41_v38  ;;  %v43_v41 = vld [vmem:[%s673_s1 + $0xa0] sm:$0xff]  ;;  %v44_v42 = vld [vmem:[%s673_s1 + $0xa8] sm:$0xff]  ;;  %v45_v44 = vld [vmem:[%s673_s1 + $0xb0] sm:$0xff] }
  0x13   :  { %v409_v43 = vpack.c.bf16 %v44_v42, %v43_v41  ;;  %v46_v45 = vld [vmem:[%s673_s1 + $0xb8] sm:$0xff]  ;;  %v21_v47 = vld [vmem:[%s672_s0] sm:$0xff]  ;;  %v133_v48 = vld [vmem:[%s674_s2 + $0x30] sm:$0xff] }
  0x14   :  { %392 = vmatpush1.bf16.msra.mxu0 %v391_v24  ;;  %v412_v46 = vpack.c.bf16 %v46_v45, %v45_v44  ;;  %v134_v49 = vld [vmem:[%s674_s2 + $0x38] sm:$0xff]  ;;  %v316_v52 = vld [vmem:[%s676_s4] ss:$0 sm:$0xff]  ;;  %v215_v54 = vld [vmem:[%s675_s3 + $0x8] sm:$0xff] }
  0x15   :  { %393 = vmatprep.subr.bf16.mxu0 %v466_v3  ;;  %422 = vmatpush3.bf16.msra.mxu1 %v421_v27  ;;  %v424_v50 = vpack.c.bf16 %v134_v49, %v133_v48  ;;  %v214_v53 = vld [vmem:[%s675_s3] sm:$0xff]  ;;  %v216_v60 = vld [vmem:[%s675_s3 + $0x10] sm:$0xff]  ;;  %v217_v61 = vld [vmem:[%s675_s3 + $0x18] sm:$0xff] }
  0x16   :  { %423 = vmatprep.subr.bf16.mxu1 %v466_v3  ;;  %v427_v58 = vpack.c.bf16 %v215_v54, %v214_v53  ;;  %v430_v62 = vpack.c.bf16 %v217_v61, %v216_v60  ;;  %v218_v63 = vld [vmem:[%s675_s3 + $0x20] sm:$0xff]  ;;  %v219_v0 = vld [vmem:[%s675_s3 + $0x28] sm:$0xff]  ;;  %v220_v2 = vld [vmem:[%s675_s3 + $0x30] sm:$0xff] }
  0x17   :  { %v433_v1 = vpack.c.bf16 %v219_v0, %v218_v63  ;;  %v221_v4 = vld [vmem:[%s675_s3 + $0x38] sm:$0xff]  ;;  %v318_v6 = vld [vmem:[%s676_s4 + $0x1] ss:$0 sm:$0xff]  ;;  %s442_s3 = scalar_lea.vmem %s309_s6, 128 }
  0x18   :  { %395 = vmatpush1.bf16.msra.mxu0 %v394_v28  ;;  %v436_v5 = vpack.c.bf16 %v221_v4, %v220_v2  ;;  %p443_p0 = scmp.ne.s32.totalorder %s309_s6, %s442_s3  ;;  %p448_p2 = scmp.lt.s32.totalorder %s442_s3, %s442_s3 }
  0x19   :  { %396 = vmatprep.subr.bf16.mxu0 %v466_v3  ;;  %425 = vmatpush3.bf16.msra.mxu1 %v424_v50 }
  0x1a   :  { %426 = vmatprep.subr.bf16.mxu1 %v466_v3  ;;  %p449_p3 = por %p448_p2, %p447_p1 }
  0x1c   :  { %398 = vmatpush1.bf16.msra.mxu0 %v397_v31  ;;  %p450_p4 = pnand %p449_p3, %p443_p0 }
  0x1d   :  { %399 = vmatprep.subr.bf16.mxu0 %v466_v3 }
  0x20   :  { %401 = vmatpush1.bf16.msra.mxu0 %v400_v34 }
  0x21   :  { %402 = vmatprep.subr.bf16.mxu0 %v466_v3 }
  0x24   :  { %404 = vmatpush1.bf16.msra.mxu0 %v403_v37 }
  0x25   :  { %405 = vmatprep.subr.bf16.mxu0 %v466_v3 }
  0x28   :  { %407 = vmatpush1.bf16.msra.mxu0 %v406_v40 }
  0x29   :  { %408 = vmatprep.subr.bf16.mxu0 %v466_v3 }
  0x2c   :  { %410 = vmatpush1.bf16.msra.mxu0 %v409_v43 }
  0x2d   :  { %411 = vmatprep.subr.bf16.mxu0 %v466_v3 }
  0x30   :  { %413 = vmatpush1.bf16.msra.mxu0 %v412_v46 }
  0x33   :  { %121 = vmatmul.mubr.f32.vlgmr.msra.gmra.mrb[0].mxu0 %v21_v47 }
 0x106   :  { %v122_v55 = vpop.f32.mrb[0].mxu0 }
 0x107   :  { %v123_v56 = vadd.f32 %v316_v52, %v122_v55  ;;  %v124_v57 = vpop.f32.mrb[1].mxu0 }
 0x109   :  { %v126_v59 = vmax.f32 %v123_v56, 0.0 }
 0x10b   :  { %357 = vmatmul.mubr.msk.f32.vlgmr.msra.gmra.mrb[0].mxu1 %vm52_vm0, %v126_v59 }
 0x10c   :  { %428 = vmatpush3.bf16.msra.mxu1 %v427_v58  ;;  %375 = vmatprep.mubr.msk.f32.mxu1 %vm467_vm1, %v468_v51 }
 0x10d   :  { %429 = vmatprep.subr.bf16.mxu1 %v466_v3 }
 0x110   :  { %431 = vmatpush3.bf16.msra.mxu1 %v430_v62 }
 0x111   :  { %432 = vmatprep.subr.bf16.mxu1 %v466_v3 }
 0x114   :  { %434 = vmatpush3.bf16.msra.mxu1 %v433_v1 }
 0x115   :  { %435 = vmatprep.subr.bf16.mxu1 %v466_v3  ;;  %v320_v3 = vld [vmem:[%s676_s4 + $0x2] ss:$0 sm:$0xff] }
 0x118   :  { %437 = vmatpush3.bf16.msra.mxu1 %v436_v5 }
 0x1de   :  { %v209_v7 = vpop.f32.mrb[0].mxu1 }
 0x1df   :  { %v210_v8 = vadd.f32 %v318_v6, %v209_v7  ;;  %v358_v9 = vpop.f32.mrb[1].mxu1 }
 0x1e1   :  { %v213_v10 = vmax.f32 %v210_v8, 0.0 }
 0x1e3   :  { %376 = vmatmul.mubr.msk.f32.vlgmr.msra.gmra.mrb[2].mxu1 %vm52_vm0, %v213_v10 }
 0x2b6   :  { %v296_v11 = vpop.f32.mrb[2].mxu1 }
 0x2b7   :  { %v297_v12 = vadd.f32 %v320_v3, %v296_v11  ;;  %v377_v13 = vpop.f32.mrb[3].mxu1 }
 0x2b9   :  { %301 = vst.msk [vmem:[#allocation2] sm:$0xff] %vm300_vm2, %v297_v12 }
 0x2ba   :  { %453 = shalt.err (!%p450_p4)
}
 0x2bb   :  { %s454_s9 = scalar_lea.hbm %s677_s5, 128 }
 0x2bc   :  { %p455_p5 = scmp.ne.s32.totalorder %s677_s5, %s454_s9  ;;  %p458_p6 = scmp.lt.u32.totalorder %s454_s9, %s677_s5 }
 0x2be   :  { %p460_p7 = pnand %p458_p6, %p455_p5 }
 0x2c0   :  { %463 = shalt.err (!%p460_p7)
}
 0x2c1   :  { %311 = dma.vmem_to_hbm [thread:$0]  %s309_s6, 128, %s677_s5, [#allocation3]  }
 0x2c2   :  { %464 = dma.done.wait [#allocation3], 128  }
 0x2c3   :  { %465 = vsyncadd [#allocation3], 4294967168 }
 0x2c4   :  { %315 = vsyncpa [#allocation3], 1 }

</bundles_post_ra>
